<compile_context>
chip_gen: v6e
topology: v6e:2x2x1
jax: 0.10.0
libtpu: 0.0.40
codegen_flags: <defaults>
</compile_context>

<pallas_src>
import jax
import jax.numpy as jnp
from jax.experimental import pallas as pl
from jax.experimental.pallas import tpu as pltpu
import numpy as np


def _copy_tile_kernel(emb_ref, o_ref):
    # emb_ref: (TILE_N, D) table tile (VMEM-resident across the inner batch
    # axis); o_ref: (TILE_N, D) slice of output block (b, n_tile).
    o_ref[...] = emb_ref[...]


def _make_copy_full_kernel(n_rows):
    def kernel(emb_ref, o_ref):
        # Fallback path: emb_ref is the whole table, o_ref is (N, D).
        o_ref[...] = emb_ref[0:n_rows, :]
    return kernel


def fixed_embedding(x, emb_table, *, target_tile_bytes=2 << 20):
    """x: (B, N, ...) — only shape[0:2] is used.  emb_table: (max_length, D)."""
    B, N = int(x.shape[0]), int(x.shape[1])
    max_length, D = emb_table.shape
    assert N <= max_length, "Input sequence length must be <= max_length"

    dtype = emb_table.dtype
    itemsize = jnp.dtype(dtype).itemsize
    # Minimum second-to-last block dim for a legal sub-full block (dtype-aware).
    min_sub = {4: 8, 2: 16, 1: 32}.get(itemsize, 8)

    out_shape = jax.ShapeDtypeStruct((B, N, D), dtype)
    cost = pl.CostEstimate(
        flops=0,
        transcendentals=0,
        bytes_accessed=(N * D + B * N * D) * itemsize,
    )

    if N % min_sub == 0 and N >= min_sub:
        # ---- tiled, pipelined path (the common case) ------------------------
        rows = max(min_sub, target_tile_bytes // max(1, D * itemsize))
        rows = (rows // min_sub) * min_sub
        tile_n = min(N, rows)
        grid = (pl.cdiv(N, tile_n), B)  # batch innermost -> table tile resident

        return pl.pallas_call(
            _copy_tile_kernel,
            out_shape=out_shape,
            grid=grid,
            in_specs=[
                # index_map ignores `b`: same block across the inner batch loop
                # -> fetched from HBM once per N-tile.
                pl.BlockSpec((tile_n, D), lambda n, b: (n, 0)),
            ],
            out_specs=pl.BlockSpec(
                (pl.Squeezed(), tile_n, D), lambda n, b: (b, n, 0)
            ),
            compiler_params=pltpu.CompilerParams(
                dimension_semantics=("parallel", "parallel"),
            ),
            cost_estimate=cost,
        )(emb_table)

    # ---- fallback for sequence lengths not aligned to the dtype sublane ----
    # Full-dim blocks are always legal: pull the whole table once, write one
    # (N, D) output slab per batch element.
    return pl.pallas_call(
        _make_copy_full_kernel(N),
        out_shape=out_shape,
        grid=(B,),
        in_specs=[pl.BlockSpec((max_length, D), lambda b: (0, 0))],
        out_specs=pl.BlockSpec((pl.Squeezed(), N, D), lambda b: (b, 0, 0)),
        compiler_params=pltpu.CompilerParams(
            dimension_semantics=("parallel",),
        ),
        cost_estimate=cost,
    )(emb_table)


# ---------------- pure-JAX reference ----------------
def _fixed_embedding_ref(x, emb_table):
    B, N = x.shape[0], x.shape[1]
    return jnp.broadcast_to(emb_table[:N][None, :, :], (B, N, emb_table.shape[1]))


if __name__ == "__main__":
    key = jax.random.PRNGKey(0)
    k_x, k_emb = jax.random.split(key)

    MAX_LENGTH, FEATURES = 16, 32
    B, N, D_IN = 2, 8, 16

    # x's values are irrelevant to the module (only its shape is used).
    x = jax.random.normal(k_x, (B, N, D_IN), jnp.float32)
    emb_table = jax.random.normal(k_emb, (MAX_LENGTH, FEATURES), jnp.float32)

    out = jax.block_until_ready(fixed_embedding(x, emb_table))
    ref = jax.block_until_ready(_fixed_embedding_ref(x, emb_table))

    assert out.shape == (B, N, FEATURES), out.shape
    np.testing.assert_allclose(np.asarray(out), np.asarray(ref), rtol=1e-6, atol=1e-6)
    print("KERNEL_OK")
</pallas_src>

<mosaic_0001>
module attributes {stable_mosaic.version = 11 : i64} {
  func.func @_copy_tile_kernel(%arg0: i32, %arg1: i32, %arg2: memref<8x32xf32, #tpu.memory_space<vmem>>, %arg3: memref<1x8x32xf32, #tpu.memory_space<vmem>>) attributes {dimension_semantics = [#tpu.dimension_semantics<parallel>, #tpu.dimension_semantics<parallel>], iteration_bounds = array<i64: 1, 2>, scalar_prefetch = 0 : i64, scratch_operands = 0 : i64, tpu.core_type = #tpu.core_type<tc>, window_params = [{transform_indices = @transform_0, window_bounds = array<i64: 8, 32>}, {transform_indices = @transform_1, window_bounds = array<i64: 1, 8, 32>}]} {
    %c0 = arith.constant 0 : index
    %c0_0 = arith.constant 0 : index
    %0 = vector.load %arg2[%c0, %c0_0] : memref<8x32xf32, #tpu.memory_space<vmem>>, vector<8x32xf32>
    %c0_1 = arith.constant 0 : index
    %c0_2 = arith.constant 0 : index
    %c0_3 = arith.constant 0 : index
    %1 = vector.load %arg3[%c0_1, %c0_2, %c0_3] : memref<1x8x32xf32, #tpu.memory_space<vmem>>, vector<1x8x32xf32>
    %2 = vector.shape_cast %1 : vector<1x8x32xf32> to vector<8x32xf32>
    %3 = vector.shape_cast %0 : vector<8x32xf32> to vector<1x8x32xf32>
    tpu.vector_store %arg3[%c0_1, %c0_2, %c0_3], %3 {strides = array<i32>} : memref<1x8x32xf32, #tpu.memory_space<vmem>>, vector<1x8x32xf32>,
    return
  }
  func.func @transform_0(%arg0: i32, %arg1: i32) -> (i32, i32) {
    %c0_i32 = arith.constant 0 : i32
    %c0_i32_0 = arith.constant 0 : i32
    return %arg0, %c0_i32 : i32, i32
  }
  func.func @transform_1(%arg0: i32, %arg1: i32) -> (i32, i32, i32) {
    %c0_i32 = arith.constant 0 : i32
    %c0_i32_0 = arith.constant 0 : i32
    return %arg1, %arg0, %c0_i32 : i32, i32, i32
  }
}

</mosaic_0001>

<bundles_post_ra>
// kernel: tpu_custom_call.1
= control target key start
LH: loop header
LB: loop body
LE: loop exit
PB: predicated region body
PF: predicated region fallthrough
CT: control target
= control target key end

     0   :  { %6 = vsyncpa [#allocation3], 0  ;;  %s535_s0 = inlined_call_operand.hbm [shape: f32[16,32], index: 0, kind: input, shape index: {}]   ;;  %s536_s1 = inlined_call_operand.hbm [shape: f32[2,8,32], index: 1, kind: output, shape index: {}]  }
   0x1   :  { %7 = vsyncpa [#allocation4], 0 }
   0x2   :  { %9 = vsyncpa [#allocation4 + $0x1], 0  ;;  %s414_s6 = smov 0   ;;  %s416_s7 = smov 0  }
   0x3   :  { %s418_s8 = smov 0   ;;  %s420_s9 = smov 0  }
   0x4   :  { %s422_s10 = smov 0   ;;  %s424_s11 = smov 0  }
   0x5 LB: > { %s217_s12 = sadd.s32 4294967295, %s400_s11   ;;  %s218_s13 = sadd.s32 4294967294, %s400_s11   ;;  %s400_s11 = sphi %s424_s11, %s15_s11   ;;  %s396_s10 = sphi %s422_s10, %s545_s10   ;;  %s392_s9 = sphi %s420_s9, %s544_s9   ;;  %s388_s8 = sphi %s418_s8, %s543_s8   ;;  %s384_s7 = sphi %s416_s7, %s542_s7   ;;  %s380_s6 = sphi %s414_s6, %s541_s6  }
   0x6   : > { %s24_s14 = sadd.s32 1, %s396_s10  ;;  %s62_s15 = sadd.s32 1, %s388_s8 }
   0x7   : > { %p25_p0 = scmp.ge.s32.totalorder %s24_s14, 2  ;;  %p72_p1 = scmp.ne.s32.totalorder %s388_s8, %s384_s7 }
   0x8   : > { %p73_p2 = scmp.eq.s32.totalorder %s217_s12, 1  ;;  %p78_p3 = scmp.ne.s32.totalorder %s384_s7, %s380_s6 }
   0x9   : > { %s547_s14 = smov (%p25_p0, %s24_s14), 0  ;;  %p79_p5 = scmp.eq.s32.totalorder %s218_s13, 1 }
   0xa   : > { %p454_p4 = por %p73_p2, %p72_p1  ;;  %s57_s17 = ssub.s32 %s396_s10, %s547_s14 }
   0xb   : > { %p219_p6 = scmp.ge.s32.totalorder %s400_s11, 1  ;;  %p60_p7 = scmp.eq.s32.totalorder %s57_s17, 0 }
   0xc   : > { %p461_p8 = por %p79_p5, %p78_p3  ;;  %p86_p9 = scmp.lt.s32.totalorder %s400_s11, 3 }
   0xd   : > { %s467_s19 = scalar_select %p60_p7, %s388_s8, %s62_s15  }
   0xe   : > { %p469_p10 = pnand %p219_p6, %p86_p9  ;;  %p473_p11 = scmp.eq.s32.totalorder %s217_s12, 0 }
   0xf   : > { %s402_s22 = smov [#allocation2]  }
  0x10   : > { %p234_p12 = pneg %p469_p10  ;;  %s101_s23 = sshll.u32 %s402_s22, 4  ;;  %s102_s23 = int_to_ptr.vmem [resolvable:$true] %s101_s23 }
  0x11   : > { %s305_s24 = scalar_lea.vmem %s102_s23, 128  ;;  %p313_p5 = scmp.lt.s32.totalorder %s102_s23, %s102_s23 }
  0x12   : > { %p235_p13 = pnand %p473_p11, %p234_p12  ;;  %p306_p1 = scmp.ne.s32.totalorder %s102_s23, %s305_s24 }
  0x13   : > { %p314_p6 = scmp.lt.s32.totalorder %s305_s24, %s305_s24 }
  0x14   : > { %p296_p0 = pneg %p235_p13 }
  0x15   : > { %p315_p7 = por %p314_p6, %p313_p5 }
  0x16   : > { %p308_p2 = pnand %p306_p1, %p296_p0 }
  0x18   : > { %p309_p3 = pneg %p308_p2 }
  0x1a   : > { %p316_p9 = pnand %p315_p7, %p309_p3 }
  0x1c   : > { %319 = shalt.err (!%p316_p9)
}
  0x1d   : > { %237 = dma.hbm_to_vmem [thread:$0]  (!%p235_p13), %s535_s0, 128, %s102_s23, [#allocation3]  }
  0x1e   : > { %114 = sbr.rel (%p469_p10) target bundleno = 61 (0x3d), region = 24 }
  0x23   : > { %371 = dma.done.wait (%p473_p11), [#allocation3], 128  }
  0x24   : > { %373 = vsyncadd (%p473_p11), [#allocation3], 4294967168  ;;  %s126_s27 = sand.u32 1, %s384_s7   ;;  %s225_s2 = sshll.u32 %s392_s9, 7  ;;  %vm130_vm0 = vcmask 261120   ;;  %v129_v0 = vld [vmem:[#allocation2] sm:$0xff] }
  0x25   : > { %s223_s28 = sshll.u32 %s126_s27, 3  ;;  %s145_s5 = scalar_lea.hbm %s536_s1, %s225_s2 }
  0x26   : > { %s128_s29 = scalar_lea.vmem [#allocation5], %s223_s28  ;;  %s133_s12 = scalar_lea.sflag [#allocation4], %s126_s27 }
  0x27   : > { %s147_s30 = sshll.u32 %s128_s29, 4  ;;  %131 = vst.msk [vmem:[%s128_s29] sm:$0xff] %vm130_vm0, %v129_v0  ;;  %s403_s15 = smov [#allocation5]   ;;  %s492_s30 = int_to_ptr.vmem [resolvable:$true] %s147_s30 }
  0x28   : > { %s320_s13 = scalar_lea.vmem %s492_s30, 128  ;;  %s324_s9 = sshll.u32 %s403_s15, 4  ;;  %s325_s9 = int_to_ptr.vmem [resolvable:$false] %s324_s9 }
  0x29   : > { %p321_p10 = scmp.ne.s32.totalorder %s492_s30, %s320_s13  ;;  %s326_s17 = scalar_lea.vmem %s325_s9, 256 }
  0x2a   : > { %p327_p13 = scmp.lt.s32.totalorder %s492_s30, %s325_s9  ;;  %p328_p0 = scmp.lt.s32.totalorder %s326_s17, %s320_s13 }
  0x2b   : > { %p322_p11 = pnand %p321_p10, %p454_p4 }
  0x2c   : > { %p329_p1 = por %p328_p0, %p327_p13 }
  0x2d   : > { %p323_p12 = pneg %p322_p11 }
  0x2f   : > { %p330_p2 = pnand %p329_p1, %p323_p12 }
  0x31   : > { %333 = shalt.err (!%p330_p2)
}
  0x32   : > { %s334_s20 = scalar_lea.hbm %s145_s5, 128  ;;  %s338_s23 = scalar_lea.hbm %s536_s1, 256 }
  0x33   : > { %p335_p3 = scmp.ne.s32.totalorder %s145_s5, %s334_s20  ;;  %p339_p7 = scmp.lt.s32.totalorder %s145_s5, %s536_s1 }
  0x34   : > { %p340_p9 = scmp.lt.s32.totalorder %s338_s23, %s334_s20 }
  0x35   : > { %p336_p5 = pnand %p335_p3, %p454_p4 }
  0x36   : > { %p341_p10 = por %p340_p9, %p339_p7 }
  0x37   : > { %p337_p6 = pneg %p336_p5 }
  0x39   : > { %p342_p11 = pnand %p341_p10, %p337_p6 }
  0x3b   : > { %345 = shalt.err (!%p342_p11)
}
  0x3c   : > { %232 = dma.vmem_to_hbm [thread:$0]  (%p454_p4), %s492_s30, 128, %s145_s5, %s133_s12  }
  0x3d PF: > { %p244_p12 = scmp.ge.s32.totalorder %s400_s11, 2  ;;  %s159_s26 = sand.u32 1, %s380_s6  }
  0x3e   : > { %s160_s27 = scalar_lea.sflag [#allocation4], %s159_s26 }
  0x3f   : > { %p239_p13 = pnand %p244_p12, %p461_p8 }
  0x41   : > { %p240_p0 = pneg %p239_p13 }
  0x43   : > { %375 = dma.done.wait (%p240_p0), %s160_s27, 128  }
  0x44   : > { %377 = vsyncadd (%p240_p0), %s160_s27, 4294967168  ;;  %s15_s11 = sadd.s32 1, %s400_s11   ;;  %s541_s6 = smov %s384_s7 }
  0x45   : > { %p12_p1 = scmp.ge.s32.totalorder %s15_s11, 4   ;;  %s542_s7 = smov %s388_s8 }
  0x46   : > { %s543_s8 = smov %s467_s19  ;;  %s544_s9 = smov %s396_s10 }
  0x47   : > { %s545_s10 = smov %s547_s14  ;;  %14 = sbr.rel (!%p12_p1) target bundleno = 5 (0x5), region = 62 }
  0x4c   :  { %165 = vsyncpa [#allocation3], 1 }
  0x4d   :  { %167 = vsyncpa [#allocation3 + $0x1], 1 }
  0x4e   :  { %168 = vsyncpa [#allocation4], 1 }
  0x4f   :  { %170 = vsyncpa [#allocation4 + $0x1], 1 }

</bundles_post_ra>
